<compile_context>
chip_gen: v5e
topology: v5e:2x2
jax: 0.10.0
libtpu: 0.0.40
codegen_flags: <defaults>
</compile_context>

<pallas_src>
import jax
import jax.numpy as jnp
from jax.experimental import pallas as pl
from jax.experimental.pallas import tpu as pltpu

_LANE = 128


def _round_up(a, b):
    return pl.cdiv(a, b) * b


def _choose_row_pack(C, E):
    """Smallest row-packing factor p (<=8) that makes the packed widths lane-dense."""
    for p in (1, 2, 4, 8):                       # both input and output dense
        if (p * C) % _LANE == 0 and (p * E) % _LANE == 0:
            return p
    for p in (1, 2, 4, 8):                       # at least the output dense
        if (p * E) % _LANE == 0:
            return p
    return 1                                     # awkward widths: no packing


def _block_diag(w, p):
    """blkdiag(w, ..., w) with p copies on the diagonal, zeros elsewhere."""
    if p == 1:
        return w
    k, m = w.shape
    out = jnp.zeros((p, k, p, m), w.dtype)
    out = out.at[jnp.arange(p), :, jnp.arange(p), :].set(w)
    return out.reshape(p * k, p * m)


def _embedder_kernel(x_ref, w1_ref, b1_ref, w2_ref, b2_ref, o_ref):
    # hidden = relu(x @ W1 + b1): bf16 (or f32) operands, f32 MXU accumulation,
    # f32 bias + ReLU epilogue (safe on v5e: no bf16 VALU needed).
    h = jnp.dot(x_ref[...], w1_ref[...], preferred_element_type=jnp.float32)
    h = jnp.maximum(h + b1_ref[...], 0.0)
    # out = hidden @ W2 + b2 (cast h to the weight dtype for the MXU fast path).
    o = jnp.dot(h.astype(w2_ref.dtype), w2_ref[...],
                preferred_element_type=jnp.float32)
    o_ref[...] = (o + b2_ref[...]).astype(o_ref.dtype)


def embedder_forward(x, w1, b1, w2, b2, *, tile_n=1024,
                     compute_dtype=jnp.bfloat16):
    """Fused two-layer MLP: relu(x @ w1 + b1) @ w2 + b2.

    x: [N, C]  w1: [C, C]  b1: [1, C]  w2: [C, E]  b2: [1, E]  ->  [N, E] (x.dtype)
    """
    N, C = x.shape
    E = w2.shape[1]
    assert w1.shape == (C, C) and b1.shape == (1, C) and b2.shape == (1, E)
    out_dtype = x.dtype

    # ---- dtypes: bf16 bulk operands (x, W1, W2), f32 biases / accumulation ----
    if compute_dtype is not None and x.dtype != compute_dtype:
        x = x.astype(compute_dtype)
    w1 = w1.astype(x.dtype)
    w2 = w2.astype(x.dtype)
    b1 = b1.astype(jnp.float32)
    b2 = b2.astype(jnp.float32)

    # ---- row packing: fold `pack` rows into lanes via block-diagonal weights ----
    pack = _choose_row_pack(C, E)
    # NOTE: at model scale precompute these packed weights once per step rather
    # than per call; here they are tiny ((pack*C)^2 and (pack*C)*(pack*E)).
    w1p = _block_diag(w1, pack)
    w2p = _block_diag(w2, pack)
    b1p = jnp.tile(b1, (1, pack))
    b2p = jnp.tile(b2, (1, pack))

    # ---- row tile selection ----
    sub = 16 if x.dtype == jnp.bfloat16 else 8      # sublane alignment for x dtype
    row_align = pack * sub
    if N <= 2 * row_align:
        tile = _round_up(N, row_align)              # single block: whole batch
    else:
        # Always >= 2 row tiles so ("parallel",) can use both v7x TensorCores;
        # cap the tile at tile_n (per-step overhead ~0.35us; 1024 is ~86% of
        # the mem-bound roofline and only a few MiB of VMEM at these widths).
        tile = min(_round_up(tile_n, row_align),
                   _round_up(pl.cdiv(N, 2), row_align))
    N_pad = _round_up(N, tile)
    if N_pad != N:
        x = jnp.pad(x, ((0, N_pad - N), (0, 0)))    # zero rows -> inert, sliced off
    x_p = x.reshape(N_pad // pack, pack * C)        # row-major identity (free)

    grid = (N_pad // tile,)
    blk = tile // pack                              # packed rows per block

    cost = pl.CostEstimate(
        flops=2 * (N_pad // pack) * ((pack * C) * (pack * C)
                                     + (pack * C) * (pack * E)),
        transcendentals=0,
        bytes_accessed=int(
            x_p.size * x_p.dtype.itemsize
            + w1p.size * w1p.dtype.itemsize + b1p.size * b1p.dtype.itemsize
            + w2p.size * w2p.dtype.itemsize + b2p.size * b2p.dtype.itemsize
            + N_pad * E * jnp.dtype(out_dtype).itemsize),
    )

    out = pl.pallas_call(
        _embedder_kernel,
        out_shape=jax.ShapeDtypeStruct((N_pad // pack, pack * E), out_dtype),
        grid_spec=pltpu.PrefetchScalarGridSpec(
            num_scalar_prefetch=0,
            grid=grid,
            in_specs=[
                pl.BlockSpec((blk, pack * C), lambda i: (i, 0)),       # x rows
                # Weights/biases are grid-invariant.  Their default double
                # buffering costs <1 MiB of VMEM at these widths; once C/E grow
                # to model scale, single-buffer them
                # (pipeline_mode=pl.Buffered(1)) or tile W1 along K and set
                # vmem_limit_bytes explicitly (v7x has 64 MiB/TC).
                pl.BlockSpec((pack * C, pack * C), lambda i: (0, 0)),  # W1 blkdiag
                pl.BlockSpec((1, pack * C), lambda i: (0, 0)),         # b1 tiled
                pl.BlockSpec((pack * C, pack * E), lambda i: (0, 0)),  # W2 blkdiag
                pl.BlockSpec((1, pack * E), lambda i: (0, 0)),         # b2 tiled
            ],
            out_specs=pl.BlockSpec((blk, pack * E), lambda i: (i, 0)),
        ),
        compiler_params=pltpu.CompilerParams(
            dimension_semantics=("parallel",),
        ),
        cost_estimate=cost,
    )(x_p, w1p, b1p, w2p, b2p)

    # Packed output -> [N, E]: row-major metadata reshape + row slice.
    out = out.reshape(N_pad, E)
    return out[:N] if N_pad != N else out


def _reference(x, w1, b1, w2, b2):
    h = jnp.maximum(x @ w1 + b1, 0.0)
    return h @ w2 + b2


def _make_params(key, C, E):
    k1, kb1, k2, kb2 = jax.random.split(key, 4)
    bound = 1.0 / (C ** 0.5)
    w1 = jax.random.uniform(k1, (C, C), jnp.float32, -bound, bound)
    b1 = jax.random.uniform(kb1, (1, C), jnp.float32, -bound, bound)
    w2 = jax.random.uniform(k2, (C, E), jnp.float32, -bound, bound)
    b2 = jax.random.uniform(kb2, (1, E), jnp.float32, -bound, bound)
    return w1, b1, w2, b2


if __name__ == "__main__":
    # Shapes consistent with Embedder(in_channels=32, embed=64)
    C, E = 32, 64
    key = jax.random.PRNGKey(0)
    kx1, kx2, kx3, kp = jax.random.split(key, 4)
    w1, b1, w2, b2 = _make_params(kp, C, E)

    # Case 1: tiny batch, default bf16 operands -> single lane-dense block.
    x1 = jax.random.normal(kx1, (16, C), dtype=jnp.float32)
    out1 = jax.block_until_ready(embedder_forward(x1, w1, b1, w2, b2))
    ref1 = _reference(x1, w1, b1, w2, b2)
    assert out1.shape == (16, E) and out1.dtype == x1.dtype
    assert jnp.allclose(out1, ref1, atol=5e-2, rtol=5e-2), "mismatch (N=16, bf16)"

    # Case 2: ragged batch -> row padding, row packing, and a 2-step parallel
    # grid (>= 2 tiles for v7x's two TensorCores).
    x2 = jax.random.normal(kx2, (333, C), dtype=jnp.float32)
    out2 = jax.block_until_ready(embedder_forward(x2, w1, b1, w2, b2))
    ref2 = _reference(x2, w1, b1, w2, b2)
    assert out2.shape == (333, E)
    assert jnp.allclose(out2, ref2, atol=5e-2, rtol=5e-2), "mismatch (N=333, bf16)"

    # Case 3: pure f32 path (compute_dtype=jnp.float32) -> tight tolerance.
    x3 = jax.random.normal(kx3, (40, C), dtype=jnp.float32)
    out3 = jax.block_until_ready(
        embedder_forward(x3, w1, b1, w2, b2, compute_dtype=jnp.float32))
    ref3 = _reference(x3, w1, b1, w2, b2)
    assert out3.shape == (40, E)
    assert jnp.allclose(out3, ref3, atol=1e-4, rtol=1e-4), "mismatch (N=40, f32)"

    print("KERNEL_OK")
</pallas_src>

<mosaic_0001>
module attributes {stable_mosaic.version = 11 : i64} {
  func.func @_embedder_kernel(%arg0: i32, %arg1: memref<16x128xbf16, #tpu.memory_space<vmem>>, %arg2: memref<128x128xbf16, #tpu.memory_space<vmem>>, %arg3: memref<1x128xf32, #tpu.memory_space<vmem>>, %arg4: memref<128x256xbf16, #tpu.memory_space<vmem>>, %arg5: memref<1x256xf32, #tpu.memory_space<vmem>>, %arg6: memref<16x256xf32, #tpu.memory_space<vmem>>) attributes {dimension_semantics = [#tpu.dimension_semantics<parallel>], iteration_bounds = array<i64: 1>, scalar_prefetch = 0 : i64, scratch_operands = 0 : i64, tpu.core_type = #tpu.core_type<tc>, window_params = [{transform_indices = @transform_0, window_bounds = array<i64: 16, 128>}, {pipeline_mode = #tpu.pipeline_mode<synchronous>, transform_indices = @transform_1, window_bounds = array<i64: 128, 128>}, {pipeline_mode = #tpu.pipeline_mode<synchronous>, transform_indices = @transform_2, window_bounds = array<i64: 1, 128>}, {pipeline_mode = #tpu.pipeline_mode<synchronous>, transform_indices = @transform_3, window_bounds = array<i64: 128, 256>}, {pipeline_mode = #tpu.pipeline_mode<synchronous>, transform_indices = @transform_4, window_bounds = array<i64: 1, 256>}, {transform_indices = @transform_5, window_bounds = array<i64: 16, 256>}]} {
    %c0 = arith.constant 0 : index
    %c0_0 = arith.constant 0 : index
    %0 = vector.load %arg1[%c0, %c0_0] : memref<16x128xbf16, #tpu.memory_space<vmem>>, vector<16x128xbf16>
    %c0_1 = arith.constant 0 : index
    %c0_2 = arith.constant 0 : index
    %1 = vector.load %arg2[%c0_1, %c0_2] : memref<128x128xbf16, #tpu.memory_space<vmem>>, vector<128x128xbf16>
    %cst = arith.constant dense<0.000000e+00> : vector<16x128xf32>
    %2 = tpu.matmul %0, %1, %cst {dimension_numbers = #tpu.dot_dimension_numbers<[1], [0], [0], [1], [0, 0, 1, 1], [], []>} : vector<16x128xbf16>, vector<128x128xbf16>, vector<16x128xf32> -> vector<16x128xf32>
    %c0_3 = arith.constant 0 : index
    %c0_4 = arith.constant 0 : index
    %3 = vector.load %arg3[%c0_3, %c0_4] : memref<1x128xf32, #tpu.memory_space<vmem>>, vector<1x128xf32>
    %4 = vector.broadcast %3 : vector<1x128xf32> to vector<16x128xf32>
    %5 = arith.addf %2, %4 : vector<16x128xf32>
    %cst_5 = arith.constant 0.000000e+00 : f32
    %6 = vector.broadcast %cst_5 : f32 to vector<16x128xf32>
    %7 = arith.maximumf %5, %6 : vector<16x128xf32>
    %8 = arith.truncf %7 : vector<16x128xf32> to vector<16x128xbf16>
    %c0_6 = arith.constant 0 : index
    %c0_7 = arith.constant 0 : index
    %9 = vector.load %arg4[%c0_6, %c0_7] : memref<128x256xbf16, #tpu.memory_space<vmem>>, vector<128x256xbf16>
    %cst_8 = arith.constant dense<0.000000e+00> : vector<16x256xf32>
    %10 = tpu.matmul %8, %9, %cst_8 {dimension_numbers = #tpu.dot_dimension_numbers<[1], [0], [0], [1], [0, 0, 1, 1], [], []>} : vector<16x128xbf16>, vector<128x256xbf16>, vector<16x256xf32> -> vector<16x256xf32>
    %c0_9 = arith.constant 0 : index
    %c0_10 = arith.constant 0 : index
    %11 = vector.load %arg5[%c0_9, %c0_10] : memref<1x256xf32, #tpu.memory_space<vmem>>, vector<1x256xf32>
    %12 = vector.broadcast %11 : vector<1x256xf32> to vector<16x256xf32>
    %13 = arith.addf %10, %12 : vector<16x256xf32>
    %c0_11 = arith.constant 0 : index
    %c0_12 = arith.constant 0 : index
    %14 = vector.load %arg6[%c0_11, %c0_12] : memref<16x256xf32, #tpu.memory_space<vmem>>, vector<16x256xf32>
    tpu.vector_store %arg6[%c0_11, %c0_12], %13 {strides = array<i32>} : memref<16x256xf32, #tpu.memory_space<vmem>>, vector<16x256xf32>,
    return
  }
  func.func @transform_0(%arg0: i32) -> (i32, i32) {
    %c0_i32 = arith.constant 0 : i32
    %c0_i32_0 = arith.constant 0 : i32
    return %arg0, %c0_i32 : i32, i32
  }
  func.func @transform_1(%arg0: i32) -> (i32, i32) {
    %c0_i32 = arith.constant 0 : i32
    %c0_i32_0 = arith.constant 0 : i32
    %c0_i32_1 = arith.constant 0 : i32
    return %c0_i32, %c0_i32_0 : i32, i32
  }
  func.func @transform_2(%arg0: i32) -> (i32, i32) {
    %c0_i32 = arith.constant 0 : i32
    %c0_i32_0 = arith.constant 0 : i32
    %c0_i32_1 = arith.constant 0 : i32
    return %c0_i32, %c0_i32_0 : i32, i32
  }
  func.func @transform_3(%arg0: i32) -> (i32, i32) {
    %c0_i32 = arith.constant 0 : i32
    %c0_i32_0 = arith.constant 0 : i32
    %c0_i32_1 = arith.constant 0 : i32
    return %c0_i32, %c0_i32_0 : i32, i32
  }
  func.func @transform_4(%arg0: i32) -> (i32, i32) {
    %c0_i32 = arith.constant 0 : i32
    %c0_i32_0 = arith.constant 0 : i32
    %c0_i32_1 = arith.constant 0 : i32
    return %c0_i32, %c0_i32_0 : i32, i32
  }
  func.func @transform_5(%arg0: i32) -> (i32, i32) {
    %c0_i32 = arith.constant 0 : i32
    %c0_i32_0 = arith.constant 0 : i32
    return %arg0, %c0_i32 : i32, i32
  }
}

</mosaic_0001>

<bundles_post_ra>
// kernel: tpu_custom_call.1
= control target key start
LH: loop header
LB: loop body
LE: loop exit
PB: predicated region body
PF: predicated region fallthrough
CT: control target
= control target key end

     0   :  { %10 = vsyncpa [#allocation3], 0  ;;  %s611_s0 = inlined_call_operand.hbm [shape: bf16[16,128], index: 0, kind: input, shape index: {}]   ;;  %s612_s1 = inlined_call_operand.hbm [shape: bf16[128,128], index: 1, kind: input, shape index: {}]   ;;  %s613_s2 = inlined_call_operand.vmem [shape: f32[1,128], index: 2, kind: input, shape index: {}]   ;;  %s614_s3 = inlined_call_operand.hbm [shape: bf16[128,256], index: 3, kind: input, shape index: {}]   ;;  %s615_s4 = inlined_call_operand.vmem [shape: f32[1,256], index: 4, kind: input, shape index: {}]   ;;  %s616_s5 = inlined_call_operand.hbm [shape: f32[16,256], index: 5, kind: output, shape index: {}]  }
   0x1   :  { %11 = vsyncpa [#allocation6], 0 }
   0x2   :  { %12 = vsyncpa [#allocation4], 0  ;;  %s30_s20 = sshll.u32 %s612_s1, 4  ;;  %s553_s21 = smov [#allocation5]   ;;  %s31_s20 = int_to_ptr.hbm [resolvable:$true] %s30_s20 }
   0x3   :  { %s32_s22 = sshll.u32 %s553_s21, 4  ;;  %s17_s25 = sshll.u32 %s611_s0, 4  ;;  %s33_s22 = int_to_ptr.vmem [resolvable:$true] %s32_s22  ;;  %s18_s25 = int_to_ptr.hbm [resolvable:$true] %s17_s25 }
   0x4   :  { %s554_s26 = smov 64   ;;  %s555_s27 = smov 4  }
   0x5   :  { %38 = dma.hbm_to_vmem [thread:$0]  %s31_s20, 1024, %s33_s22, [#allocation6], %s554_s26, %s554_s26, %s555_s27  }
   0x6   :  { %s556_s28 = smov [#allocation2]   ;;  %s45_s7 = sshll.u32 %s614_s3, 4  ;;  %s46_s7 = int_to_ptr.hbm [resolvable:$true] %s45_s7 }
   0x7   :  { %s19_s29 = sshll.u32 %s556_s28, 4  ;;  %s557_s1 = smov [#allocation7]   ;;  %s20_s29 = int_to_ptr.vmem [resolvable:$true] %s19_s29 }
   0x8   :  { %25 = dma.hbm_to_vmem [thread:$0]  %s18_s25, 128, %s20_s29, [#allocation3], %s554_s26, %s554_s26, %s555_s27  }
   0x9   :  { %s47_s8 = sshll.u32 %s557_s1, 4  ;;  %s558_s9 = smov 128   ;;  %s48_s8 = int_to_ptr.vmem [resolvable:$true] %s47_s8 }
   0xa   :  { %s559_s10 = smov 8  }
   0xb   :  { %53 = dma.hbm_to_vmem [thread:$0]  %s46_s7, 2048, %s48_s8, [#allocation6], %s558_s9, %s558_s9, %s559_s10  }
   0xc   :  { %547 = dma.done.wait [#allocation3], 128  }
   0xd   :  { %548 = vsyncadd [#allocation3], 4294967168 }
   0xe   :  { %549 = dma.done.wait [#allocation6], 3072  }
   0xf   :  { %550 = vsyncadd [#allocation6], 4294964224  ;;  %v423_v0 = vld [vmem:[#allocation5 + $0x38] sm:$0xff]  ;;  %v422_v1 = vld [vmem:[#allocation5 + $0x30] sm:$0xff]  ;;  %s301_s16 = sshll.u32 %s616_s5, 4  ;;  %s562_s17 = smov 16   ;;  %s302_s16 = int_to_ptr.hbm [resolvable:$true] %s301_s16 }
  0x10   :  { %144 = vmatpush.bf16.msra.mxu0 %v423_v0  ;;  %v409_v2 = vld [vmem:[#allocation7 + $0x70] sm:$0xf]  ;;  %v439_v3 = vld [vmem:[#allocation7 + $0x74] sm:$0xf0]  ;;  %v438_v4 = vld [vmem:[#allocation7 + $0x74] sm:$0xf] }
  0x11   :  { %v410_v5 = vor.u32 %v439_v3, %v409_v2  ;;  %v411_v6 = vld [vmem:[#allocation7 + $0x78] sm:$0xf0]  ;;  %v401_v7 = vld [vmem:[#allocation7 + $0x60] sm:$0xf]  ;;  %v437_v8 = vld [vmem:[#allocation7 + $0x64] sm:$0xf0] }
  0x12   :  { %v414_v9 = vor.u32 %v438_v4, %v411_v6  ;;  %v436_v10 = vld [vmem:[#allocation7 + $0x64] sm:$0xf]  ;;  %v403_v11 = vld [vmem:[#allocation7 + $0x68] sm:$0xf0]  ;;  %v402_v13 = vor.u32 %v437_v8, %v401_v7  ;;  %v393_v15 = vld [vmem:[#allocation7 + $0x50] sm:$0xf] }
  0x13   :  { %v421_v12 = vld [vmem:[#allocation5 + $0x28] sm:$0xff]  ;;  %263 = vmatpush.bf16.msra.mxu1 %v410_v5  ;;  %v406_v14 = vor.u32 %v436_v10, %v403_v11  ;;  %v435_v16 = vld [vmem:[#allocation7 + $0x54] sm:$0xf0]  ;;  %v434_v17 = vld [vmem:[#allocation7 + $0x54] sm:$0xf] }
  0x14   :  { %145 = vmatpush.bf16.msra.mxu0 %v422_v1  ;;  %277 = vmatpush.bf16.msra.mxu2 %v414_v9  ;;  %v395_v18 = vld [vmem:[#allocation7 + $0x58] sm:$0xf0]  ;;  %v420_v19 = vld [vmem:[#allocation5 + $0x20] sm:$0xff]  ;;  %v394_v20 = vor.u32 %v435_v16, %v393_v15  ;;  %v433_v23 = vld [vmem:[#allocation7 + $0x44] sm:$0xf0] }
  0x15   :  { %v398_v21 = vor.u32 %v434_v17, %v395_v18  ;;  %v385_v22 = vld [vmem:[#allocation7 + $0x40] sm:$0xf]  ;;  %v432_v24 = vld [vmem:[#allocation7 + $0x44] sm:$0xf]  ;;  %v387_v25 = vld [vmem:[#allocation7 + $0x48] sm:$0xf0] }
  0x16   :  { %v419_v26 = vld [vmem:[#allocation5 + $0x18] sm:$0xff]  ;;  %v386_v27 = vor.u32 %v433_v23, %v385_v22  ;;  %v390_v28 = vor.u32 %v432_v24, %v387_v25  ;;  %v418_v29 = vld [vmem:[#allocation5 + $0x10] sm:$0xff]  ;;  %v417_v30 = vld [vmem:[#allocation5 + $0x8] sm:$0xff] }
  0x17   :  { %264 = vmatpush.bf16.msra.mxu1 %v402_v13  ;;  %v416_v31 = vld [vmem:[#allocation5] sm:$0xff]  ;;  %v415_v32 = vld [vmem:[#allocation2] sm:$0xff]  ;;  %v377_v33 = vld [vmem:[#allocation7 + $0x30] sm:$0xf] }
  0x18   :  { %146 = vmatpush.bf16.msra.mxu0 %v421_v12  ;;  %278 = vmatpush.bf16.msra.mxu2 %v406_v14  ;;  %v431_v34 = vld [vmem:[#allocation7 + $0x34] sm:$0xf0]  ;;  %v430_v35 = vld [vmem:[#allocation7 + $0x34] sm:$0xf]  ;;  %v379_v37 = vld [vmem:[#allocation7 + $0x38] sm:$0xf0] }
  0x19   :  { %v378_v36 = vor.u32 %v431_v34, %v377_v33  ;;  %v382_v38 = vor.u32 %v430_v35, %v379_v37  ;;  %v369_v39 = vld [vmem:[#allocation7 + $0x20] sm:$0xf]  ;;  %v429_v40 = vld [vmem:[#allocation7 + $0x24] sm:$0xf0]  ;;  %v428_v41 = vld [vmem:[#allocation7 + $0x24] sm:$0xf] }
  0x1a   :  { %v370_v42 = vor.u32 %v429_v40, %v369_v39  ;;  %v371_v43 = vld [vmem:[#allocation7 + $0x28] sm:$0xf0]  ;;  %v361_v45 = vld [vmem:[#allocation7 + $0x10] sm:$0xf]  ;;  %v427_v46 = vld [vmem:[#allocation7 + $0x14] sm:$0xf0] }
  0x1b   :  { %265 = vmatpush.bf16.msra.mxu1 %v394_v20  ;;  %v374_v44 = vor.u32 %v428_v41, %v371_v43  ;;  %v426_v47 = vld [vmem:[#allocation7 + $0x14] sm:$0xf]  ;;  %v362_v48 = vor.u32 %v427_v46, %v361_v45  ;;  %v363_v49 = vld [vmem:[#allocation7 + $0x18] sm:$0xf0]  ;;  %v353_v51 = vld [vmem:[#allocation7] sm:$0xf] }
  0x1c   :  { %147 = vmatpush.bf16.msra.mxu0 %v420_v19  ;;  %279 = vmatpush.bf16.msra.mxu2 %v398_v21  ;;  %v366_v50 = vor.u32 %v426_v47, %v363_v49  ;;  %v425_v52 = vld [vmem:[#allocation7 + $0x4] sm:$0xf0]  ;;  %v424_v53 = vld [vmem:[#allocation7 + $0x4] sm:$0xf]  ;;  %v355_v55 = vld [vmem:[#allocation7 + $0x8] sm:$0xf0] }
  0x1d   :  { %v354_v54 = vor.u32 %v425_v52, %v353_v51  ;;  %v358_v56 = vor.u32 %v424_v53, %v355_v55  ;;  %v450_v58 = vld [vmem:[%s613_s2] ss:$0 sm:$0xff]  ;;  %s560_s2 = smov [#allocation8]  }
  0x1e   :  { %v177_v1 = vld [vmem:[%s615_s4] sm:$0x3]  ;;  %s299_s13 = sshll.u32 %s560_s2, 4  ;;  %s561_s4 = smov 256   ;;  %s300_s13 = int_to_ptr.vmem [resolvable:$true] %s299_s13 }
  0x1f   :  { %266 = vmatpush.bf16.msra.mxu1 %v386_v27  ;;  %v179_v2 = vperm.slane %v177_v1, 0  ;;  %v180_v5 = vperm.slane %v177_v1, 1 }
  0x20   :  { %148 = vmatpush.bf16.msra.mxu0 %v419_v26  ;;  %280 = vmatpush.bf16.msra.mxu2 %v390_v28 }
  0x23   :  { %267 = vmatpush.bf16.msra.mxu1 %v378_v36 }
  0x24   :  { %149 = vmatpush.bf16.msra.mxu0 %v418_v29  ;;  %281 = vmatpush.bf16.msra.mxu2 %v382_v38 }
  0x27   :  { %268 = vmatpush.bf16.msra.mxu1 %v370_v42 }
  0x28   :  { %150 = vmatpush.bf16.msra.mxu0 %v417_v30  ;;  %282 = vmatpush.bf16.msra.mxu2 %v374_v44 }
  0x2b   :  { %269 = vmatpush.bf16.msra.mxu1 %v362_v48 }
  0x2c   :  { %151 = vmatpush.bf16.msra.mxu0 %v416_v31  ;;  %283 = vmatpush.bf16.msra.mxu2 %v366_v50 }
  0x2f   :  { %152 = vmatmul.bf16.vlgmr.msra.gmra.mxu0 %v415_v32  ;;  %270 = vmatpush.bf16.msra.mxu1 %v354_v54 }
  0x30   :  { %284 = vmatpush.bf16.msra.mxu2 %v358_v56 }
  0xac   :  { %v153_v57 = vpop.f32.mrf.mxu0 }
  0xad   :  { %v154_v59 = vadd.f32 %v450_v58, %v153_v57 }
  0xaf   :  { %v158_v62 = vmax.f32 %v154_v59, 0.0 }
  0xb4   :  { %v155_v60 = vpop.f32.mrf.mxu0 }
  0xb5   :  { %v156_v61 = vadd.f32 %v450_v58, %v155_v60 }
  0xb7   :  { %v159_v63 = vmax.f32 %v156_v61, 0.0 }
  0xb9   :  { %v160_v0 = vpack.c.bf16 %v159_v63, %v158_v62 }
  0xbb   :  { %271 = vmatmul.bf16.vlgmr.msra.gmra.mxu1 %v160_v0  ;;  %285 = vmatmul.bf16.vlgmr.msra.gmra.mxu2 %v160_v0 }
 0x138   :  { %v272_v3 = vpop.f32.mrf.mxu1 }
 0x139   :  { %v273_v4 = vadd.f32 %v272_v3, %v179_v2 }
 0x13b   :  { %291 = vst [vmem:[#allocation8] sm:$0xff] %v273_v4 }
 0x13e   :  { %v286_v6 = vpop.f32.mrf.mxu2 }
 0x13f   :  { %v287_v7 = vadd.f32 %v286_v6, %v180_v5 }
 0x140   :  { %v274_v8 = vpop.f32.mrf.mxu1 }
 0x141   :  { %292 = vst [vmem:[#allocation8 + $0x8] sm:$0xff] %v287_v7  ;;  %v275_v9 = vadd.f32 %v274_v8, %v179_v2 }
 0x143   :  { %293 = vst [vmem:[#allocation8 + $0x10] sm:$0xff] %v275_v9 }
 0x146   :  { %v288_v10 = vpop.f32.mrf.mxu2 }
 0x147   :  { %v289_v11 = vadd.f32 %v288_v10, %v180_v5 }
 0x149   :  { %294 = vst [vmem:[#allocation8 + $0x18] sm:$0xff] %v289_v11 }
 0x14a   :  { %307 = dma.vmem_to_hbm [thread:$0]  %s300_s13, 512, %s302_s16, [#allocation4], %s561_s4, %s561_s4, %s562_s17  }
 0x14b   :  { %551 = dma.done.wait [#allocation4], 512  }
 0x14c   :  { %552 = vsyncadd [#allocation4], 4294966784 }
 0x14d   :  { %312 = vsyncpa [#allocation3], 1 }
 0x14e   :  { %313 = vsyncpa [#allocation6], 1 }
 0x14f   :  { %314 = vsyncpa [#allocation4], 1 }

</bundles_post_ra>
